<compile_context>
chip_gen: v5e
topology: v5e:2x2
jax: 0.10.0
libtpu: 0.0.40
codegen_flags: <defaults>
</compile_context>

<pallas_src>
import math
import functools

import jax
import jax.numpy as jnp
from jax import lax
from jax.experimental import pallas as pl
from jax.experimental.pallas import tpu as pltpu


# ---------------------------------------------------------------------------
# Sequential recurrence kernel (the part XLA cannot pipeline well).
# ---------------------------------------------------------------------------
def _grud_recurrence_kernel(dh_ref, pre_ref, wzr_ref, whh_ref, out_ref, h_ref):
    # dh_ref  : (tt, bb, Hp)    per-step decay exp(-relu(gamma_h(delta)))
    # pre_ref : (tt, bb, 3*Hp)  per-step [z | r | h~] pre-activations (x & mask)
    # wzr_ref : (Hp, 2*Hp)      fused recurrent weights for z and r
    # whh_ref : (Hp, Hp)        recurrent weight for h~
    # out_ref : (tt, bb, Hp)    hidden state per step (time-major)
    # h_ref   : (bb, Hp)        VMEM scratch: state carried across time blocks
    tt = dh_ref.shape[0]
    hp = out_ref.shape[-1]
    cdt = wzr_ref.dtype

    # Reset the carried state at the start of each batch block's time sweep.
    @pl.when(pl.program_id(1) == 0)
    def _():
        h_ref[...] = jnp.zeros_like(h_ref)

    wzr = wzr_ref[...]
    whh = whh_ref[...]

    def step(t, h):
        pre_t = pre_ref[t]                                    # (bb, 3*Hp)
        h = dh_ref[t] * h                                     # GRU-D decay
        zr = pre_t[:, :2 * hp] + jnp.dot(
            h.astype(cdt), wzr, preferred_element_type=jnp.float32)
        # r first: it feeds the second matmul (critical path); z comes later.
        r = jax.nn.sigmoid(zr[:, hp:])
        h_tilde = jnp.tanh(
            pre_t[:, 2 * hp:]
            + jnp.dot((r * h).astype(cdt), whh,
                      preferred_element_type=jnp.float32))
        z = jax.nn.sigmoid(zr[:, :hp])
        h = (1.0 - z) * h + z * h_tilde
        out_ref[t] = h
        return h

    h_ref[...] = lax.fori_loop(0, tt, step, h_ref[...], unroll=min(4, tt))


# ---------------------------------------------------------------------------
# Static planning: batch/time block sizes and a device-aware VMEM limit.
# ---------------------------------------------------------------------------
def _device_vmem_capacity():
    try:
        return int(pltpu.get_tpu_info().vmem_capacity_bytes)
    except Exception:
        return 64 << 20   # conservative fallback (v7x per-core VMEM)


def _plan(B, T, Hp, w_itemsize, time_block):
    # Batch block: split only if the halves stay sublane-aligned (mult. of 8);
    # two blocks are enough to feed both v7x TensorCores.
    bb = B // 2 if (B % 2 == 0 and (B // 2) % 8 == 0) else B

    cap = _device_vmem_capacity()
    usable = int(0.85 * cap)                       # leave compiler headroom
    weight_bytes = (Hp * 2 * Hp + Hp * Hp) * w_itemsize
    per_step = bb * 5 * Hp * 4                     # dh + pre(3Hp) + out, f32
    scratch = bb * Hp * 4
    slack = 8 << 20

    budget = max(usable - 2 * weight_bytes - scratch - slack, per_step * 8)
    if time_block is None:
        tt = max(1, min(T, budget // (2 * per_step)))
    else:
        tt = max(1, int(time_block))
    t_pad = ((T + tt - 1) // tt) * tt              # cdiv * tt (tail is padded)

    need = 2 * per_step * tt + 2 * weight_bytes + scratch + (4 << 20)
    vmem_limit = int(min(max(need, 32 << 20), max(usable, need)))
    return bb, tt, t_pad, vmem_limit


# ---------------------------------------------------------------------------
# Forward pass.
# ---------------------------------------------------------------------------
@functools.partial(
    jax.jit,
    static_argnames=("output_last", "time_block", "compute_dtype", "time_major"))
def grud_forward(inp, x_mean, params, *, output_last=False, time_block=None,
                 compute_dtype=jnp.float32, time_major=False):
    """GRU-D forward.  inp: (B, 4, T, D) f32 with channels (X, X_last, Mask,
    Delta); x_mean: (B, T, D) f32.  Returns (B, T, H), or (B, H) if
    output_last, or (T, B, H) if time_major."""
    B, C, T, D = inp.shape
    assert C == 4
    # GRU-D's `h = delta_h * h` forces hidden_size == input_size.
    H = params["diag_gx"].shape[0]
    Hp = params["whh"].shape[0]
    assert H == D, "GRU-D forward requires hidden_size == input_size"

    X = inp[:, 0]          # (B, T, D)
    X_last = inp[:, 1]
    Mask = inp[:, 2]
    Delta = inp[:, 3]

    # -----------------------------------------------------------------------
    # Hoisted, h-independent precompute (wide time-batched GEMMs in XLA),
    # emitted time-major and already lane-padded to Hp via the packed weights.
    # -----------------------------------------------------------------------
    # gamma_x: identity-masked FilterLinear == diagonal -> elementwise (exact).
    delta_x = jnp.exp(-jnp.maximum(Delta * params["diag_gx"] + params["bgx"], 0.0))

    # gamma_h for all steps: one (B*T, D) x (D, Hp) GEMM, time-major output.
    gh = jnp.einsum("btd,de->tbe", Delta, params["wgh_t"]) + params["bgh"]
    delta_h = jnp.exp(-jnp.maximum(gh, 0.0))                       # (T, B, Hp)

    # missing-value imputation (elementwise, f32)
    x_imp = Mask * X + (1.0 - Mask) * (delta_x * X_last + (1.0 - delta_x) * x_mean)

    # x / mask contributions to all three gates, fused over [z | r | h~] with
    # each gate block starting at a 128-lane boundary.
    pre = (jnp.einsum("btd,dk->tbk", x_imp, params["wx_zrh"])
           + jnp.einsum("btd,dk->tbk", Mask, params["wm_zrh"])
           + params["b_zrh"])                                      # (T, B, 3*Hp)

    # -----------------------------------------------------------------------
    # Sequential recurrence (Pallas).
    # -----------------------------------------------------------------------
    w_itemsize = jnp.dtype(compute_dtype).itemsize
    bb, tt, T_pad, vmem_limit = _plan(B, T, Hp, w_itemsize, time_block)

    if T_pad != T:
        # Padded steps are benign (dh=0 keeps h at 0) and sliced off below.
        tp = ((0, T_pad - T), (0, 0), (0, 0))
        delta_h = jnp.pad(delta_h, tp)
        pre = jnp.pad(pre, tp)

    wzr = params["wzr_h"].astype(compute_dtype)
    whh = params["whh"].astype(compute_dtype)

    grid = (B // bb, T_pad // tt)

    out_full = pl.pallas_call(
        _grud_recurrence_kernel,
        out_shape=jax.ShapeDtypeStruct((T_pad, B, Hp), jnp.float32),
        grid_spec=pltpu.PrefetchScalarGridSpec(
            num_scalar_prefetch=0,
            grid=grid,
            in_specs=[
                pl.BlockSpec((tt, bb, Hp), lambda b, i: (i, b, 0)),
                pl.BlockSpec((tt, bb, 3 * Hp), lambda b, i: (i, b, 0)),
                pl.BlockSpec((Hp, 2 * Hp), lambda b, i: (0, 0)),
                pl.BlockSpec((Hp, Hp), lambda b, i: (0, 0)),
            ],
            out_specs=pl.BlockSpec((tt, bb, Hp), lambda b, i: (i, b, 0)),
            scratch_shapes=[pltpu.VMEM((bb, Hp), jnp.float32)],
        ),
        compiler_params=pltpu.CompilerParams(
            dimension_semantics=("parallel", "arbitrary"),
            vmem_limit_bytes=vmem_limit),
    )(delta_h, pre, wzr, whh)

    out = out_full[:T]                               # drop padded tail steps
    if output_last:
        return out[T - 1, :, :H]                     # (B, H), no transpose
    out = out[:, :, :H]
    if time_major:
        return out                                   # (T, B, H), no transpose
    # TODO(synk): prefer time_major=True consumers to skip this HBM round-trip.
    return jnp.transpose(out, (1, 0, 2))             # (B, T, H)


# ---------------------------------------------------------------------------
# Parameter init (mirrors nn.Linear / FilterLinear reset_parameters) + packing
# into the lane-padded (Hp = round_up(H, 128)) kernel layout.
# ---------------------------------------------------------------------------
def init_params(key, input_size, hidden_size, lane=128):
    D, H = input_size, hidden_size
    assert hidden_size == input_size, \
        "GRU-D `h = delta_h * h` requires hidden_size == input_size"
    Hp = ((H + lane - 1) // lane) * lane
    comb = D + H + D  # [x, h, mask]

    def linear_init(k, out_f, in_f):
        kw, kb = jax.random.split(k)
        stdv = 1.0 / math.sqrt(in_f)
        w = jax.random.uniform(kw, (out_f, in_f), jnp.float32, -stdv, stdv)
        b = jax.random.uniform(kb, (out_f,), jnp.float32, -stdv, stdv)
        return w, b

    ks = jax.random.split(key, 5)
    wz, bz = linear_init(ks[0], H, comb)
    wr, br = linear_init(ks[1], H, comb)
    wh, bh = linear_init(ks[2], H, comb)
    wgx, bgx = linear_init(ks[3], D, D)    # FilterLinear (identity-masked)
    wgh, bgh = linear_init(ks[4], D, D)

    raw = dict(wz=wz, bz=bz, wr=wr, br=br, wh=wh, bh=bh,
               wgx=wgx, bgx=bgx, wgh=wgh, bgh=bgh)

    def split_t(w):  # (H, D+H+D) -> x / h / mask column blocks, (in, out)
        return w[:, :D].T, w[:, D:D + H].T, w[:, D + H:].T

    wz_x, wz_h, wz_m = split_t(wz)
    wr_x, wr_h, wr_m = split_t(wr)
    wh_x, wh_h, wh_m = split_t(wh)

    def pad_out(a):   # (in, H) -> (in, Hp): zero-padded output lanes
        return jnp.pad(a, ((0, 0), (0, Hp - a.shape[1])))

    def pad_vec(v):   # (H,) -> (Hp,)
        return jnp.pad(v, (0, Hp - v.shape[0]))

    def pad_sq(a):    # (H, H) -> (Hp, Hp)
        return jnp.pad(a, ((0, Hp - a.shape[0]), (0, Hp - a.shape[1])))

    packed = dict(
        # FilterLinear identity mask => only the diagonal survives (exact).
        diag_gx=jnp.diagonal(wgx),                                # (D,)
        bgx=bgx,                                                  # (D,)
        wgh_t=pad_out(wgh.T), bgh=pad_vec(bgh),                   # (D, Hp), (Hp,)
        # x / mask projections fused over [z | r | h~], each gate block padded
        # to a 128-lane boundary -> (D, 3*Hp)
        wx_zrh=jnp.concatenate([pad_out(wz_x), pad_out(wr_x), pad_out(wh_x)],
                               axis=1),
        wm_zrh=jnp.concatenate([pad_out(wz_m), pad_out(wr_m), pad_out(wh_m)],
                               axis=1),
        b_zrh=jnp.concatenate([pad_vec(bz), pad_vec(br), pad_vec(bh)]),  # (3*Hp,)
        # recurrent projections: [z | r] fused -> (Hp, 2*Hp); h~ -> (Hp, Hp)
        wzr_h=jnp.concatenate([pad_sq(wz_h), pad_sq(wr_h)], axis=1),
        whh=pad_sq(wh_h),
    )
    return packed, raw


# ---------------------------------------------------------------------------
# Pure-JAX reference mirroring the PyTorch forward (validation only).
# ---------------------------------------------------------------------------
def grud_reference(inp, x_mean, raw):
    B, _, T, D = inp.shape
    H = raw["bz"].shape[0]
    diag_gx = jnp.diagonal(raw["wgx"])
    h = jnp.zeros((B, H), jnp.float32)
    outs = []
    for i in range(T):
        x, xl, m, d = (inp[:, c, i, :] for c in range(4))
        xm = x_mean[:, i, :]
        dx = jnp.exp(-jnp.maximum(0.0, d * diag_gx + raw["bgx"]))
        dh = jnp.exp(-jnp.maximum(0.0, d @ raw["wgh"].T + raw["bgh"]))
        x = m * x + (1.0 - m) * (dx * xl + (1.0 - dx) * xm)
        h = dh * h
        comb = jnp.concatenate([x, h, m], axis=1)
        z = jax.nn.sigmoid(comb @ raw["wz"].T + raw["bz"])
        r = jax.nn.sigmoid(comb @ raw["wr"].T + raw["br"])
        comb_r = jnp.concatenate([x, r * h, m], axis=1)
        h_tilde = jnp.tanh(comb_r @ raw["wh"].T + raw["bh"])
        h = (1.0 - z) * h + z * h_tilde
        outs.append(h)
    return jnp.stack(outs, axis=1)


if __name__ == "__main__":
    B, T, D = 2, 12, 32
    H = D  # GRU-D's `h = delta_h * h` requires hidden_size == input_size

    key = jax.random.PRNGKey(0)
    k_in, k_mask, k_mean, k_par = jax.random.split(key, 4)

    inp = jax.random.normal(k_in, (B, 4, T, D), jnp.float32)
    # Mask channel binary, Delta channel non-negative (as in real data)
    mask = (jax.random.uniform(k_mask, (B, T, D)) > 0.3).astype(jnp.float32)
    delta = jnp.abs(inp[:, 3])
    inp = inp.at[:, 2].set(mask).at[:, 3].set(delta)

    x_mean = jax.random.normal(k_mean, (B, T, D), jnp.float32)
    params, raw = init_params(k_par, D, H)

    ref = grud_reference(inp, x_mean, raw)

    # 1) full output with several time blocks (tests state carry across grid).
    out = jax.block_until_ready(grud_forward(inp, x_mean, params, time_block=4))
    assert out.shape == (B, T, H)
    err = float(jnp.max(jnp.abs(out - ref)))
    assert err < 1e-4, f"f32 mismatch vs reference: max abs err {err}"

    # 2) output_last + ragged T (T=12 padded to 16 -> exercises tail padding).
    out_last = jax.block_until_ready(
        grud_forward(inp, x_mean, params, output_last=True, time_block=8))
    assert out_last.shape == (B, H)
    err = float(jnp.max(jnp.abs(out_last - ref[:, -1, :])))
    assert err < 1e-4, f"output_last mismatch: max abs err {err}"

    # 3) bf16 recurrent weights (MXU-native) with the default tile heuristic.
    out_bf16 = jax.block_until_ready(
        grud_forward(inp, x_mean, params, compute_dtype=jnp.bfloat16))
    err = float(jnp.max(jnp.abs(out_bf16 - ref)))
    assert err < 7.5e-2, f"bf16 mismatch vs reference: max abs err {err}"

    print("KERNEL_OK")
</pallas_src>

<mosaic_0001>
module attributes {stable_mosaic.version = 11 : i64} {
  func.func @_grud_recurrence_kernel(%arg0: i32, %arg1: i32, %arg2: memref<4x2x128xf32, #tpu.memory_space<vmem>>, %arg3: memref<4x2x384xf32, #tpu.memory_space<vmem>>, %arg4: memref<128x256xf32, #tpu.memory_space<vmem>>, %arg5: memref<128x128xf32, #tpu.memory_space<vmem>>, %arg6: memref<4x2x128xf32, #tpu.memory_space<vmem>>, %arg7: memref<2x128xf32, #tpu.memory_space<vmem>>) attributes {dimension_semantics = [#tpu.dimension_semantics<parallel>, #tpu.dimension_semantics<arbitrary>], iteration_bounds = array<i64: 1, 3>, scalar_prefetch = 0 : i64, scratch_operands = 1 : i64, tpu.core_type = #tpu.core_type<tc>, window_params = [{transform_indices = @transform_0, window_bounds = array<i64: 4, 2, 128>}, {transform_indices = @transform_1, window_bounds = array<i64: 4, 2, 384>}, {pipeline_mode = #tpu.pipeline_mode<synchronous>, transform_indices = @transform_2, window_bounds = array<i64: 128, 256>}, {pipeline_mode = #tpu.pipeline_mode<synchronous>, transform_indices = @transform_3, window_bounds = array<i64: 128, 128>}, {transform_indices = @transform_4, window_bounds = array<i64: 4, 2, 128>}]} {
    %c0_i32 = arith.constant 0 : i32
    %0 = arith.cmpi eq, %arg1, %c0_i32 : i32
    %1 = arith.extui %0 : i1 to i32
    %c0_i32_0 = arith.constant 0 : i32
    %2 = arith.cmpi ne, %1, %c0_i32_0 : i32
    scf.if %2 {
      %cst_52 = arith.constant 0.000000e+00 : f32
      %151 = vector.broadcast %cst_52 : f32 to vector<2x128xf32>
      %c0_53 = arith.constant 0 : index
      %c0_54 = arith.constant 0 : index
      %152 = vector.load %arg7[%c0_53, %c0_54] : memref<2x128xf32, #tpu.memory_space<vmem>>, vector<2x128xf32>
      tpu.vector_store %arg7[%c0_53, %c0_54], %151 {strides = array<i32>} : memref<2x128xf32, #tpu.memory_space<vmem>>, vector<2x128xf32>,
    } else {
    }
    %c0 = arith.constant 0 : index
    %c0_1 = arith.constant 0 : index
    %3 = vector.load %arg4[%c0, %c0_1] : memref<128x256xf32, #tpu.memory_space<vmem>>, vector<128x256xf32>
    %c0_2 = arith.constant 0 : index
    %c0_3 = arith.constant 0 : index
    %4 = vector.load %arg5[%c0_2, %c0_3] : memref<128x128xf32, #tpu.memory_space<vmem>>, vector<128x128xf32>
    %c0_4 = arith.constant 0 : index
    %c0_5 = arith.constant 0 : index
    %5 = vector.load %arg7[%c0_4, %c0_5] : memref<2x128xf32, #tpu.memory_space<vmem>>, vector<2x128xf32>
    %c0_i32_6 = arith.constant 0 : i32
    %6 = arith.index_cast %c0_i32_6 : i32 to index
    %c0_7 = arith.constant 0 : index
    %c0_8 = arith.constant 0 : index
    %7 = vector.load %arg3[%6, %c0_7, %c0_8] : memref<4x2x384xf32, #tpu.memory_space<vmem>>, vector<1x2x384xf32>
    %8 = vector.shape_cast %7 : vector<1x2x384xf32> to vector<2x384xf32>
    %9 = arith.index_cast %c0_i32_6 : i32 to index
    %c0_9 = arith.constant 0 : index
    %c0_10 = arith.constant 0 : index
    %10 = vector.load %arg2[%9, %c0_9, %c0_10] : memref<4x2x128xf32, #tpu.memory_space<vmem>>, vector<1x2x128xf32>
    %11 = vector.shape_cast %10 : vector<1x2x128xf32> to vector<2x128xf32>
    %12 = arith.mulf %11, %5 : vector<2x128xf32>
    %13 = vector.extract_strided_slice %8 {offsets = [0, 0], sizes = [2, 256], strides = [1, 1]} : vector<2x384xf32> to vector<2x256xf32>
    %cst = arith.constant dense<0.000000e+00> : vector<2x256xf32>
    %14 = tpu.matmul %12, %3, %cst {dimension_numbers = #tpu.dot_dimension_numbers<[1], [0], [0], [1], [0, 0, 1, 1], [], []>} : vector<2x128xf32>, vector<128x256xf32>, vector<2x256xf32> -> vector<2x256xf32>
    %15 = arith.addf %13, %14 : vector<2x256xf32>
    %16 = vector.extract_strided_slice %15 {offsets = [0, 128], sizes = [2, 128], strides = [1, 1]} : vector<2x256xf32> to vector<2x128xf32>
    %17 = arith.negf %16 : vector<2x128xf32>
    %18 = math.exp %17 : vector<2x128xf32>
    %cst_11 = arith.constant 1.000000e+00 : f32
    %19 = vector.broadcast %cst_11 : f32 to vector<2x128xf32>
    %20 = arith.addf %19, %18 : vector<2x128xf32>
    %21 = arith.divf %19, %20 : vector<2x128xf32>
    %22 = vector.extract_strided_slice %8 {offsets = [0, 256], sizes = [2, 128], strides = [1, 1]} : vector<2x384xf32> to vector<2x128xf32>
    %23 = arith.mulf %21, %12 : vector<2x128xf32>
    %cst_12 = arith.constant dense<0.000000e+00> : vector<2x128xf32>
    %24 = tpu.matmul %23, %4, %cst_12 {dimension_numbers = #tpu.dot_dimension_numbers<[1], [0], [0], [1], [0, 0, 1, 1], [], []>} : vector<2x128xf32>, vector<128x128xf32>, vector<2x128xf32> -> vector<2x128xf32>
    %25 = arith.addf %22, %24 : vector<2x128xf32>
    %26 = math.tanh %25 : vector<2x128xf32>
    %27 = vector.extract_strided_slice %15 {offsets = [0, 0], sizes = [2, 128], strides = [1, 1]} : vector<2x256xf32> to vector<2x128xf32>
    %28 = arith.negf %27 : vector<2x128xf32>
    %29 = math.exp %28 : vector<2x128xf32>
    %cst_13 = arith.constant 1.000000e+00 : f32
    %30 = vector.broadcast %cst_13 : f32 to vector<2x128xf32>
    %31 = arith.addf %30, %29 : vector<2x128xf32>
    %32 = arith.divf %30, %31 : vector<2x128xf32>
    %cst_14 = arith.constant 1.000000e+00 : f32
    %33 = vector.broadcast %cst_14 : f32 to vector<2x128xf32>
    %34 = arith.subf %33, %32 : vector<2x128xf32>
    %35 = arith.mulf %34, %12 : vector<2x128xf32>
    %36 = arith.mulf %32, %26 : vector<2x128xf32>
    %37 = arith.addf %35, %36 : vector<2x128xf32>
    %38 = arith.index_cast %c0_i32_6 : i32 to index
    %c0_15 = arith.constant 0 : index
    %c0_16 = arith.constant 0 : index
    %39 = vector.load %arg6[%38, %c0_15, %c0_16] : memref<4x2x128xf32, #tpu.memory_space<vmem>>, vector<1x2x128xf32>
    %40 = vector.shape_cast %39 : vector<1x2x128xf32> to vector<2x128xf32>
    %41 = vector.shape_cast %37 : vector<2x128xf32> to vector<1x2x128xf32>
    tpu.vector_store %arg6[%38, %c0_15, %c0_16], %41 {strides = array<i32>} : memref<4x2x128xf32, #tpu.memory_space<vmem>>, vector<1x2x128xf32>,
    %c1_i32 = arith.constant 1 : i32
    %42 = arith.index_cast %c1_i32 : i32 to index
    %c0_17 = arith.constant 0 : index
    %c0_18 = arith.constant 0 : index
    %43 = vector.load %arg3[%42, %c0_17, %c0_18] : memref<4x2x384xf32, #tpu.memory_space<vmem>>, vector<1x2x384xf32>
    %44 = vector.shape_cast %43 : vector<1x2x384xf32> to vector<2x384xf32>
    %45 = arith.index_cast %c1_i32 : i32 to index
    %c0_19 = arith.constant 0 : index
    %c0_20 = arith.constant 0 : index
    %46 = vector.load %arg2[%45, %c0_19, %c0_20] : memref<4x2x128xf32, #tpu.memory_space<vmem>>, vector<1x2x128xf32>
    %47 = vector.shape_cast %46 : vector<1x2x128xf32> to vector<2x128xf32>
    %48 = arith.mulf %47, %37 : vector<2x128xf32>
    %49 = vector.extract_strided_slice %44 {offsets = [0, 0], sizes = [2, 256], strides = [1, 1]} : vector<2x384xf32> to vector<2x256xf32>
    %cst_21 = arith.constant dense<0.000000e+00> : vector<2x256xf32>
    %50 = tpu.matmul %48, %3, %cst_21 {dimension_numbers = #tpu.dot_dimension_numbers<[1], [0], [0], [1], [0, 0, 1, 1], [], []>} : vector<2x128xf32>, vector<128x256xf32>, vector<2x256xf32> -> vector<2x256xf32>
    %51 = arith.addf %49, %50 : vector<2x256xf32>
    %52 = vector.extract_strided_slice %51 {offsets = [0, 128], sizes = [2, 128], strides = [1, 1]} : vector<2x256xf32> to vector<2x128xf32>
    %53 = arith.negf %52 : vector<2x128xf32>
    %54 = math.exp %53 : vector<2x128xf32>
    %cst_22 = arith.constant 1.000000e+00 : f32
    %55 = vector.broadcast %cst_22 : f32 to vector<2x128xf32>
    %56 = arith.addf %55, %54 : vector<2x128xf32>
    %57 = arith.divf %55, %56 : vector<2x128xf32>
    %58 = vector.extract_strided_slice %44 {offsets = [0, 256], sizes = [2, 128], strides = [1, 1]} : vector<2x384xf32> to vector<2x128xf32>
    %59 = arith.mulf %57, %48 : vector<2x128xf32>
    %cst_23 = arith.constant dense<0.000000e+00> : vector<2x128xf32>
    %60 = tpu.matmul %59, %4, %cst_23 {dimension_numbers = #tpu.dot_dimension_numbers<[1], [0], [0], [1], [0, 0, 1, 1], [], []>} : vector<2x128xf32>, vector<128x128xf32>, vector<2x128xf32> -> vector<2x128xf32>
    %61 = arith.addf %58, %60 : vector<2x128xf32>
    %62 = math.tanh %61 : vector<2x128xf32>
    %63 = vector.extract_strided_slice %51 {offsets = [0, 0], sizes = [2, 128], strides = [1, 1]} : vector<2x256xf32> to vector<2x128xf32>
    %64 = arith.negf %63 : vector<2x128xf32>
    %65 = math.exp %64 : vector<2x128xf32>
    %cst_24 = arith.constant 1.000000e+00 : f32
    %66 = vector.broadcast %cst_24 : f32 to vector<2x128xf32>
    %67 = arith.addf %66, %65 : vector<2x128xf32>
    %68 = arith.divf %66, %67 : vector<2x128xf32>
    %cst_25 = arith.constant 1.000000e+00 : f32
    %69 = vector.broadcast %cst_25 : f32 to vector<2x128xf32>
    %70 = arith.subf %69, %68 : vector<2x128xf32>
    %71 = arith.mulf %70, %48 : vector<2x128xf32>
    %72 = arith.mulf %68, %62 : vector<2x128xf32>
    %73 = arith.addf %71, %72 : vector<2x128xf32>
    %74 = arith.index_cast %c1_i32 : i32 to index
    %c0_26 = arith.constant 0 : index
    %c0_27 = arith.constant 0 : index
    %75 = vector.load %arg6[%74, %c0_26, %c0_27] : memref<4x2x128xf32, #tpu.memory_space<vmem>>, vector<1x2x128xf32>
    %76 = vector.shape_cast %75 : vector<1x2x128xf32> to vector<2x128xf32>
    %77 = vector.shape_cast %73 : vector<2x128xf32> to vector<1x2x128xf32>
    tpu.vector_store %arg6[%74, %c0_26, %c0_27], %77 {strides = array<i32>} : memref<4x2x128xf32, #tpu.memory_space<vmem>>, vector<1x2x128xf32>,
    %c2_i32 = arith.constant 2 : i32
    %78 = arith.index_cast %c2_i32 : i32 to index
    %c0_28 = arith.constant 0 : index
    %c0_29 = arith.constant 0 : index
    %79 = vector.load %arg3[%78, %c0_28, %c0_29] : memref<4x2x384xf32, #tpu.memory_space<vmem>>, vector<1x2x384xf32>
    %80 = vector.shape_cast %79 : vector<1x2x384xf32> to vector<2x384xf32>
    %81 = arith.index_cast %c2_i32 : i32 to index
    %c0_30 = arith.constant 0 : index
    %c0_31 = arith.constant 0 : index
    %82 = vector.load %arg2[%81, %c0_30, %c0_31] : memref<4x2x128xf32, #tpu.memory_space<vmem>>, vector<1x2x128xf32>
    %83 = vector.shape_cast %82 : vector<1x2x128xf32> to vector<2x128xf32>
    %84 = arith.mulf %83, %73 : vector<2x128xf32>
    %85 = vector.extract_strided_slice %80 {offsets = [0, 0], sizes = [2, 256], strides = [1, 1]} : vector<2x384xf32> to vector<2x256xf32>
    %cst_32 = arith.constant dense<0.000000e+00> : vector<2x256xf32>
    %86 = tpu.matmul %84, %3, %cst_32 {dimension_numbers = #tpu.dot_dimension_numbers<[1], [0], [0], [1], [0, 0, 1, 1], [], []>} : vector<2x128xf32>, vector<128x256xf32>, vector<2x256xf32> -> vector<2x256xf32>
    %87 = arith.addf %85, %86 : vector<2x256xf32>
    %88 = vector.extract_strided_slice %87 {offsets = [0, 128], sizes = [2, 128], strides = [1, 1]} : vector<2x256xf32> to vector<2x128xf32>
    %89 = arith.negf %88 : vector<2x128xf32>
    %90 = math.exp %89 : vector<2x128xf32>
    %cst_33 = arith.constant 1.000000e+00 : f32
    %91 = vector.broadcast %cst_33 : f32 to vector<2x128xf32>
    %92 = arith.addf %91, %90 : vector<2x128xf32>
    %93 = arith.divf %91, %92 : vector<2x128xf32>
    %94 = vector.extract_strided_slice %80 {offsets = [0, 256], sizes = [2, 128], strides = [1, 1]} : vector<2x384xf32> to vector<2x128xf32>
    %95 = arith.mulf %93, %84 : vector<2x128xf32>
    %cst_34 = arith.constant dense<0.000000e+00> : vector<2x128xf32>
    %96 = tpu.matmul %95, %4, %cst_34 {dimension_numbers = #tpu.dot_dimension_numbers<[1], [0], [0], [1], [0, 0, 1, 1], [], []>} : vector<2x128xf32>, vector<128x128xf32>, vector<2x128xf32> -> vector<2x128xf32>
    %97 = arith.addf %94, %96 : vector<2x128xf32>
    %98 = math.tanh %97 : vector<2x128xf32>
    %99 = vector.extract_strided_slice %87 {offsets = [0, 0], sizes = [2, 128], strides = [1, 1]} : vector<2x256xf32> to vector<2x128xf32>
    %100 = arith.negf %99 : vector<2x128xf32>
    %101 = math.exp %100 : vector<2x128xf32>
    %cst_35 = arith.constant 1.000000e+00 : f32
    %102 = vector.broadcast %cst_35 : f32 to vector<2x128xf32>
    %103 = arith.addf %102, %101 : vector<2x128xf32>
    %104 = arith.divf %102, %103 : vector<2x128xf32>
    %cst_36 = arith.constant 1.000000e+00 : f32
    %105 = vector.broadcast %cst_36 : f32 to vector<2x128xf32>
    %106 = arith.subf %105, %104 : vector<2x128xf32>
    %107 = arith.mulf %106, %84 : vector<2x128xf32>
    %108 = arith.mulf %104, %98 : vector<2x128xf32>
    %109 = arith.addf %107, %108 : vector<2x128xf32>
    %110 = arith.index_cast %c2_i32 : i32 to index
    %c0_37 = arith.constant 0 : index
    %c0_38 = arith.constant 0 : index
    %111 = vector.load %arg6[%110, %c0_37, %c0_38] : memref<4x2x128xf32, #tpu.memory_space<vmem>>, vector<1x2x128xf32>
    %112 = vector.shape_cast %111 : vector<1x2x128xf32> to vector<2x128xf32>
    %113 = vector.shape_cast %109 : vector<2x128xf32> to vector<1x2x128xf32>
    tpu.vector_store %arg6[%110, %c0_37, %c0_38], %113 {strides = array<i32>} : memref<4x2x128xf32, #tpu.memory_space<vmem>>, vector<1x2x128xf32>,
    %c3_i32 = arith.constant 3 : i32
    %114 = arith.index_cast %c3_i32 : i32 to index
    %c0_39 = arith.constant 0 : index
    %c0_40 = arith.constant 0 : index
    %115 = vector.load %arg3[%114, %c0_39, %c0_40] : memref<4x2x384xf32, #tpu.memory_space<vmem>>, vector<1x2x384xf32>
    %116 = vector.shape_cast %115 : vector<1x2x384xf32> to vector<2x384xf32>
    %117 = arith.index_cast %c3_i32 : i32 to index
    %c0_41 = arith.constant 0 : index
    %c0_42 = arith.constant 0 : index
    %118 = vector.load %arg2[%117, %c0_41, %c0_42] : memref<4x2x128xf32, #tpu.memory_space<vmem>>, vector<1x2x128xf32>
    %119 = vector.shape_cast %118 : vector<1x2x128xf32> to vector<2x128xf32>
    %120 = arith.mulf %119, %109 : vector<2x128xf32>
    %121 = vector.extract_strided_slice %116 {offsets = [0, 0], sizes = [2, 256], strides = [1, 1]} : vector<2x384xf32> to vector<2x256xf32>
    %cst_43 = arith.constant dense<0.000000e+00> : vector<2x256xf32>
    %122 = tpu.matmul %120, %3, %cst_43 {dimension_numbers = #tpu.dot_dimension_numbers<[1], [0], [0], [1], [0, 0, 1, 1], [], []>} : vector<2x128xf32>, vector<128x256xf32>, vector<2x256xf32> -> vector<2x256xf32>
    %123 = arith.addf %121, %122 : vector<2x256xf32>
    %124 = vector.extract_strided_slice %123 {offsets = [0, 128], sizes = [2, 128], strides = [1, 1]} : vector<2x256xf32> to vector<2x128xf32>
    %125 = arith.negf %124 : vector<2x128xf32>
    %126 = math.exp %125 : vector<2x128xf32>
    %cst_44 = arith.constant 1.000000e+00 : f32
    %127 = vector.broadcast %cst_44 : f32 to vector<2x128xf32>
    %128 = arith.addf %127, %126 : vector<2x128xf32>
    %129 = arith.divf %127, %128 : vector<2x128xf32>
    %130 = vector.extract_strided_slice %116 {offsets = [0, 256], sizes = [2, 128], strides = [1, 1]} : vector<2x384xf32> to vector<2x128xf32>
    %131 = arith.mulf %129, %120 : vector<2x128xf32>
    %cst_45 = arith.constant dense<0.000000e+00> : vector<2x128xf32>
    %132 = tpu.matmul %131, %4, %cst_45 {dimension_numbers = #tpu.dot_dimension_numbers<[1], [0], [0], [1], [0, 0, 1, 1], [], []>} : vector<2x128xf32>, vector<128x128xf32>, vector<2x128xf32> -> vector<2x128xf32>
    %133 = arith.addf %130, %132 : vector<2x128xf32>
    %134 = math.tanh %133 : vector<2x128xf32>
    %135 = vector.extract_strided_slice %123 {offsets = [0, 0], sizes = [2, 128], strides = [1, 1]} : vector<2x256xf32> to vector<2x128xf32>
    %136 = arith.negf %135 : vector<2x128xf32>
    %137 = math.exp %136 : vector<2x128xf32>
    %cst_46 = arith.constant 1.000000e+00 : f32
    %138 = vector.broadcast %cst_46 : f32 to vector<2x128xf32>
    %139 = arith.addf %138, %137 : vector<2x128xf32>
    %140 = arith.divf %138, %139 : vector<2x128xf32>
    %cst_47 = arith.constant 1.000000e+00 : f32
    %141 = vector.broadcast %cst_47 : f32 to vector<2x128xf32>
    %142 = arith.subf %141, %140 : vector<2x128xf32>
    %143 = arith.mulf %142, %120 : vector<2x128xf32>
    %144 = arith.mulf %140, %134 : vector<2x128xf32>
    %145 = arith.addf %143, %144 : vector<2x128xf32>
    %146 = arith.index_cast %c3_i32 : i32 to index
    %c0_48 = arith.constant 0 : index
    %c0_49 = arith.constant 0 : index
    %147 = vector.load %arg6[%146, %c0_48, %c0_49] : memref<4x2x128xf32, #tpu.memory_space<vmem>>, vector<1x2x128xf32>
    %148 = vector.shape_cast %147 : vector<1x2x128xf32> to vector<2x128xf32>
    %149 = vector.shape_cast %145 : vector<2x128xf32> to vector<1x2x128xf32>
    tpu.vector_store %arg6[%146, %c0_48, %c0_49], %149 {strides = array<i32>} : memref<4x2x128xf32, #tpu.memory_space<vmem>>, vector<1x2x128xf32>,
    %c4_i32 = arith.constant 4 : i32
    %c0_50 = arith.constant 0 : index
    %c0_51 = arith.constant 0 : index
    %150 = vector.load %arg7[%c0_50, %c0_51] : memref<2x128xf32, #tpu.memory_space<vmem>>, vector<2x128xf32>
    tpu.vector_store %arg7[%c0_50, %c0_51], %145 {strides = array<i32>} : memref<2x128xf32, #tpu.memory_space<vmem>>, vector<2x128xf32>,
    return
  }
  func.func @transform_0(%arg0: i32, %arg1: i32) -> (i32, i32, i32) {
    %c0_i32 = arith.constant 0 : i32
    %c0_i32_0 = arith.constant 0 : i32
    return %arg1, %arg0, %c0_i32 : i32, i32, i32
  }
  func.func @transform_1(%arg0: i32, %arg1: i32) -> (i32, i32, i32) {
    %c0_i32 = arith.constant 0 : i32
    %c0_i32_0 = arith.constant 0 : i32
    return %arg1, %arg0, %c0_i32 : i32, i32, i32
  }
  func.func @transform_2(%arg0: i32, %arg1: i32) -> (i32, i32) {
    %c0_i32 = arith.constant 0 : i32
    %c0_i32_0 = arith.constant 0 : i32
    %c0_i32_1 = arith.constant 0 : i32
    return %c0_i32, %c0_i32_0 : i32, i32
  }
  func.func @transform_3(%arg0: i32, %arg1: i32) -> (i32, i32) {
    %c0_i32 = arith.constant 0 : i32
    %c0_i32_0 = arith.constant 0 : i32
    %c0_i32_1 = arith.constant 0 : i32
    return %c0_i32, %c0_i32_0 : i32, i32
  }
  func.func @transform_4(%arg0: i32, %arg1: i32) -> (i32, i32, i32) {
    %c0_i32 = arith.constant 0 : i32
    %c0_i32_0 = arith.constant 0 : i32
    return %arg1, %arg0, %c0_i32 : i32, i32, i32
  }
}

</mosaic_0001>

<bundles_post_ra>
// kernel: grud_forward.1
= control target key start
LH: loop header
LB: loop body
LE: loop exit
PB: predicated region body
PF: predicated region fallthrough
CT: control target
= control target key end

     0   :  { %s1066_s15 = smov 0   ;;  %s1068_s16 = smov 0   ;;  %s1576_s0 = inlined_call_operand.vmem [shape: f32[12,2,128], index: 0, kind: input, shape index: {}]   ;;  %s1577_s1 = inlined_call_operand.vmem [shape: f32[12,2,384], index: 1, kind: input, shape index: {}]   ;;  %s1578_s2 = inlined_call_operand.vmem [shape: f32[128,256], index: 2, kind: input, shape index: {}]   ;;  %s1579_s3 = inlined_call_operand.vmem [shape: f32[128,128], index: 3, kind: input, shape index: {}]   ;;  %s1580_s4 = inlined_call_operand.vmem [shape: f32[12,2,128], index: 4, kind: output, shape index: {}]  }
   0x1   :  { %s1070_s17 = smov 0  }
   0x2 LB: > { %s23_s18 = sadd.s32 1, %s1034_s16  ;;  %p923_p0 = scmp.ge.s32.totalorder %s1038_s17, 1  ;;  %s1038_s17 = sphi %s1070_s17, %s14_s17   ;;  %s1034_s16 = sphi %s1068_s16, %s1582_s16   ;;  %s1030_s15 = sphi %s1066_s15, %s1581_s15  }
   0x3   : > { %p24_p1 = scmp.ge.s32.totalorder %s23_s18, 3  ;;  %p200_p2 = scmp.lt.s32.totalorder %s1038_s17, 4 }
   0x5   : > { %s1584_s18 = smov (%p24_p1, %s23_s18), 0  ;;  %p201_p3 = pnand %p923_p0, %p200_p2 }
   0x6   : > { %s924_s19 = sshll.u32 (!%p201_p3), %s1030_s15, 2  ;;  %p930_p5 = scmp.ne.s32.totalorder (!%p201_p3), %s1030_s15, 0 }
   0x7   : > { %204 = sbr.rel (%p201_p3) target bundleno = 1295 (0x50f), region = 36  ;;  %p243_p4 = scmp.lt.s32.totalorder (!%p201_p3), %s924_s19, 11 }
   0xc   : > { %s1586_s19 = smov (!%p243_p4, %s924_s19), 11  ;;  %274 = sbr.rel (%p930_p5) target bundleno = 19 (0x13), region = 40 }
   0xd   : > { %s925_s20 = sshll.u32 %s1586_s19, 1  ;;  %s950_s21 = smul.u32 6, %s1586_s19 }
   0xe   : > { %s1087_s24 = scalar_lea.vmem %s1576_s0, %s925_s20  ;;  %s1092_s27 = scalar_lea.vmem %s1580_s4, %s925_s20 }
   0xf   : > { %s1097_s30 = scalar_lea.vmem %s1577_s1, %s950_s21 }
  0x11   : > { %v1040_v0 = vmov 0.0  }
  0x12   : > { %275 = vst [vmem:[#allocation2] sm:$0x3] %v1040_v0 }
  0x13 PF: > { %v1102_v1 = vld [vmem:[%s1578_s2 + $0xf8] sm:$0xff]  ;;  %v1107_v2 = vld [vmem:[%s1578_s2 + $0xf0] sm:$0xff]  ;;  %v1112_v3 = vld [vmem:[%s1578_s2 + $0xe8] sm:$0xff]  ;;  %vm371_vm0 = vcmask 1041408  }
  0x14   : > { %348 = vmatpush.msra.mxu1 %v1102_v1  ;;  %328 = vmatpush.msra.mxu0 %v1107_v2  ;;  %v1119_v4 = vld [vmem:[%s1578_s2 + $0xe0] sm:$0xff]  ;;  %v1124_v5 = vld [vmem:[%s1578_s2 + $0xd8] sm:$0xff]  ;;  %v1129_v6 = vld [vmem:[%s1578_s2 + $0xd0] sm:$0xff] }
  0x15   : > { %452 = vmatpush.msra.mxu3 %v1107_v2  ;;  %v1137_v7 = vld [vmem:[%s1578_s2 + $0xc8] sm:$0xff]  ;;  %v1142_v8 = vld [vmem:[%s1578_s2 + $0xc0] sm:$0xff]  ;;  %v1150_v9 = vld [vmem:[%s1578_s2 + $0xb8] sm:$0xff] }
  0x16   : > { %349 = vmatpush.msra.mxu1 %v1112_v3  ;;  %329 = vmatpush.msra.mxu0 %v1119_v4  ;;  %v1155_v10 = vld [vmem:[%s1578_s2 + $0xb0] sm:$0xff]  ;;  %v1163_v11 = vld [vmem:[%s1578_s2 + $0xa8] sm:$0xff]  ;;  %v1168_v12 = vld [vmem:[%s1578_s2 + $0xa0] sm:$0xff] }
  0x17   : > { %453 = vmatpush.msra.mxu3 %v1119_v4  ;;  %v1176_v13 = vld [vmem:[%s1578_s2 + $0x98] sm:$0xff]  ;;  %v1181_v14 = vld [vmem:[%s1578_s2 + $0x90] sm:$0xff]  ;;  %v1189_v15 = vld [vmem:[%s1578_s2 + $0x88] sm:$0xff] }
  0x18   : > { %350 = vmatpush.msra.mxu1 %v1124_v5  ;;  %330 = vmatpush.msra.mxu0 %v1129_v6  ;;  %v1194_v16 = vld [vmem:[%s1578_s2 + $0x80] sm:$0xff]  ;;  %v1202_v17 = vld [vmem:[%s1578_s2 + $0x78] sm:$0xff]  ;;  %v1207_v18 = vld [vmem:[%s1578_s2 + $0x70] sm:$0xff] }
  0x19   : > { %454 = vmatpush.msra.mxu3 %v1129_v6  ;;  %v1215_v19 = vld [vmem:[%s1578_s2 + $0x68] sm:$0xff]  ;;  %v1220_v20 = vld [vmem:[%s1578_s2 + $0x60] sm:$0xff]  ;;  %v1228_v21 = vld [vmem:[%s1578_s2 + $0x58] sm:$0xff] }
  0x1a   : > { %351 = vmatpush.msra.mxu1 %v1137_v7  ;;  %331 = vmatpush.msra.mxu0 %v1142_v8  ;;  %v1233_v22 = vld [vmem:[%s1578_s2 + $0x50] sm:$0xff]  ;;  %v1241_v23 = vld [vmem:[%s1578_s2 + $0x48] sm:$0xff]  ;;  %v1246_v24 = vld [vmem:[%s1578_s2 + $0x40] sm:$0xff] }
  0x1b   : > { %455 = vmatpush.msra.mxu3 %v1142_v8  ;;  %v1254_v25 = vld [vmem:[%s1578_s2 + $0x38] sm:$0xff]  ;;  %v1259_v26 = vld [vmem:[%s1578_s2 + $0x30] sm:$0xff]  ;;  %v1267_v27 = vld [vmem:[%s1578_s2 + $0x28] sm:$0xff] }
  0x1c   : > { %352 = vmatpush.msra.mxu1 %v1150_v9  ;;  %332 = vmatpush.msra.mxu0 %v1155_v10  ;;  %v1272_v28 = vld [vmem:[%s1578_s2 + $0x20] sm:$0xff]  ;;  %v1281_v31 = vld [vmem:[%s1578_s2 + $0x18] sm:$0xff]  ;;  %v1286_v32 = vld [vmem:[%s1578_s2 + $0x10] sm:$0xff] }
  0x1d   : > { %456 = vmatpush.msra.mxu3 %v1155_v10  ;;  %v324_v29 = vld [vmem:[#allocation2] sm:$0x3]  ;;  %v1294_v33 = vld [vmem:[%s1578_s2 + $0x8] sm:$0xff]  ;;  %v1347_v36 = vld [vmem:[%s1579_s3 + $0x78] sm:$0xff] }
  0x1e   : > { %353 = vmatpush.msra.mxu1 %v1163_v11  ;;  %333 = vmatpush.msra.mxu0 %v1168_v12  ;;  %v326_v30 = vld [vmem:[%s1087_s24] sm:$0x3]  ;;  %v1354_v37 = vld [vmem:[%s1579_s3 + $0x70] sm:$0xff]  ;;  %v1362_v38 = vld [vmem:[%s1579_s3 + $0x68] sm:$0xff] }
  0x1f   : > { %457 = vmatpush.msra.mxu3 %v1168_v12  ;;  %v1296_v34 = vmul.f32 %v326_v30, %v324_v29  ;;  %v1301_v35 = vld [vmem:[%s1578_s2] sm:$0xff]  ;;  %398 = vmatpush.msra.mxu2 %v1347_v36  ;;  %v1378_v40 = vld [vmem:[%s1579_s3 + $0x58] sm:$0xff]  ;;  %v1386_v41 = vld [vmem:[%s1579_s3 + $0x50] sm:$0xff] }
  0x20   : > { %354 = vmatpush.msra.mxu1 %v1176_v13  ;;  %334 = vmatpush.msra.mxu0 %v1181_v14  ;;  %v1370_v39 = vld [vmem:[%s1579_s3 + $0x60] sm:$0xff]  ;;  %v1394_v42 = vld [vmem:[%s1579_s3 + $0x48] sm:$0xff]  ;;  %v1410_v44 = vld [vmem:[%s1579_s3 + $0x38] sm:$0xff] }
  0x21   : > { %458 = vmatpush.msra.mxu3 %v1181_v14  ;;  %399 = vmatpush.msra.mxu2 %v1354_v37  ;;  %v1402_v43 = vld [vmem:[%s1579_s3 + $0x40] sm:$0xff]  ;;  %v1418_v45 = vld [vmem:[%s1579_s3 + $0x30] sm:$0xff]  ;;  %v1423_v46 = vld [vmem:[%s1579_s3 + $0x28] sm:$0xff] }
  0x22   : > { %355 = vmatpush.msra.mxu1 %v1189_v15  ;;  %335 = vmatpush.msra.mxu0 %v1194_v16  ;;  %v1431_v47 = vld [vmem:[%s1579_s3 + $0x20] sm:$0xff]  ;;  %v1439_v48 = vld [vmem:[%s1579_s3 + $0x18] sm:$0xff]  ;;  %v1447_v49 = vld [vmem:[%s1579_s3 + $0x10] sm:$0xff] }
  0x23   : > { %459 = vmatpush.msra.mxu3 %v1194_v16  ;;  %400 = vmatpush.msra.mxu2 %v1362_v38  ;;  %v1455_v52 = vld [vmem:[%s1579_s3 + $0x8] sm:$0xff]  ;;  %v1459_v54 = vld [vmem:[%s1097_s30] sm:$0x3f] }
  0x24   : > { %356 = vmatpush.msra.mxu1 %v1202_v17  ;;  %336 = vmatpush.msra.mxu0 %v1207_v18  ;;  %v1466_v55 = vld [vmem:[%s1579_s3] sm:$0xff] }
  0x25   : > { %460 = vmatpush.msra.mxu3 %v1207_v18  ;;  %401 = vmatpush.msra.mxu2 %v1370_v39  ;;  %v934_v29 = vld [vmem:[%s1087_s24 + $0x2] sm:$0x3] }
  0x26   : > { %357 = vmatpush.msra.mxu1 %v1215_v19  ;;  %337 = vmatpush.msra.mxu0 %v1220_v20 }
  0x27   : > { %461 = vmatpush.msra.mxu3 %v1220_v20  ;;  %402 = vmatpush.msra.mxu2 %v1378_v40 }
  0x28   : > { %358 = vmatpush.msra.mxu1 %v1228_v21  ;;  %338 = vmatpush.msra.mxu0 %v1233_v22 }
  0x29   : > { %462 = vmatpush.msra.mxu3 %v1233_v22  ;;  %403 = vmatpush.msra.mxu2 %v1386_v41 }
  0x2a   : > { %359 = vmatpush.msra.mxu1 %v1241_v23  ;;  %339 = vmatpush.msra.mxu0 %v1246_v24 }
  0x2b   : > { %463 = vmatpush.msra.mxu3 %v1246_v24  ;;  %404 = vmatpush.msra.mxu2 %v1394_v42 }
  0x2c   : > { %360 = vmatpush.msra.mxu1 %v1254_v25  ;;  %340 = vmatpush.msra.mxu0 %v1259_v26 }
  0x2d   : > { %464 = vmatpush.msra.mxu3 %v1259_v26  ;;  %405 = vmatpush.msra.mxu2 %v1402_v43 }
  0x2e   : > { %361 = vmatpush.msra.mxu1 %v1267_v27  ;;  %341 = vmatpush.msra.mxu0 %v1272_v28 }
  0x2f   : > { %465 = vmatpush.msra.mxu3 %v1272_v28  ;;  %406 = vmatpush.msra.mxu2 %v1410_v44 }
  0x30   : > { %362 = vmatpush.msra.mxu1 %v1281_v31  ;;  %342 = vmatpush.msra.mxu0 %v1286_v32 }
  0x31   : > { %466 = vmatpush.msra.mxu3 %v1286_v32  ;;  %407 = vmatpush.msra.mxu2 %v1418_v45 }
  0x32   : > { %363 = vmatpush.msra.mxu1 %v1294_v33  ;;  %343 = vmatpush.msra.mxu0 %v1301_v35 }
  0x33   : > { %364 = vmatmul.f32.vlgmr.msra.gmra.mxu1 %v1296_v34  ;;  %344 = vmatmul.f32.vlgmr.msra.gmra.mxu0 %v1296_v34 }
  0x34   : > { %472 = vmatpush.msrb.mxu0 %v1102_v1  ;;  %467 = vmatpush.msra.mxu3 %v1301_v35 }
  0x35   : > { %521 = vmatpush.msrb.mxu1 %v1347_v36  ;;  %408 = vmatpush.msra.mxu2 %v1423_v46 }
  0x36   : > { %596 = vmatpush.msrb.mxu3 %v1102_v1  ;;  %473 = vmatpush.msrb.mxu0 %v1112_v3 }
  0x37   : > { %522 = vmatpush.msrb.mxu1 %v1354_v37  ;;  %409 = vmatpush.msra.mxu2 %v1431_v47 }
  0x38   : > { %597 = vmatpush.msrb.mxu3 %v1112_v3  ;;  %474 = vmatpush.msrb.mxu0 %v1124_v5 }
  0x39   : > { %523 = vmatpush.msrb.mxu1 %v1362_v38  ;;  %410 = vmatpush.msra.mxu2 %v1439_v48 }
  0x3a   : > { %598 = vmatpush.msrb.mxu3 %v1124_v5  ;;  %475 = vmatpush.msrb.mxu0 %v1137_v7 }
  0x3b   : > { %524 = vmatpush.msrb.mxu1 %v1370_v39  ;;  %411 = vmatpush.msra.mxu2 %v1447_v49 }
  0x3c   : > { %599 = vmatpush.msrb.mxu3 %v1137_v7  ;;  %476 = vmatpush.msrb.mxu0 %v1150_v9 }
  0x3d   : > { %525 = vmatpush.msrb.mxu1 %v1378_v40  ;;  %412 = vmatpush.msra.mxu2 %v1455_v52 }
  0x3e   : > { %600 = vmatpush.msrb.mxu3 %v1150_v9  ;;  %477 = vmatpush.msrb.mxu0 %v1163_v11 }
  0x3f   : > { %526 = vmatpush.msrb.mxu1 %v1386_v41  ;;  %413 = vmatpush.msra.mxu2 %v1466_v55 }
  0x40   : > { %601 = vmatpush.msrb.mxu3 %v1163_v11  ;;  %478 = vmatpush.msrb.mxu0 %v1176_v13 }
  0x41   : > { %527 = vmatpush.msrb.mxu1 %v1394_v42  ;;  %576 = vmatpush.msrb.mxu2 %v1107_v2 }
  0x42   : > { %602 = vmatpush.msrb.mxu3 %v1176_v13  ;;  %479 = vmatpush.msrb.mxu0 %v1189_v15 }
  0x43   : > { %528 = vmatpush.msrb.mxu1 %v1402_v43  ;;  %577 = vmatpush.msrb.mxu2 %v1119_v4 }
  0x44   : > { %603 = vmatpush.msrb.mxu3 %v1189_v15  ;;  %480 = vmatpush.msrb.mxu0 %v1202_v17 }
  0x45   : > { %529 = vmatpush.msrb.mxu1 %v1410_v44  ;;  %578 = vmatpush.msrb.mxu2 %v1129_v6 }
  0x46   : > { %604 = vmatpush.msrb.mxu3 %v1202_v17  ;;  %481 = vmatpush.msrb.mxu0 %v1215_v19 }
  0x47   : > { %530 = vmatpush.msrb.mxu1 %v1418_v45  ;;  %579 = vmatpush.msrb.mxu2 %v1142_v8 }
  0x48   : > { %605 = vmatpush.msrb.mxu3 %v1215_v19  ;;  %482 = vmatpush.msrb.mxu0 %v1228_v21 }
  0x49   : > { %531 = vmatpush.msrb.mxu1 %v1423_v46  ;;  %580 = vmatpush.msrb.mxu2 %v1155_v10 }
  0x4a   : > { %606 = vmatpush.msrb.mxu3 %v1228_v21  ;;  %483 = vmatpush.msrb.mxu0 %v1241_v23 }
  0x4b   : > { %532 = vmatpush.msrb.mxu1 %v1431_v47  ;;  %581 = vmatpush.msrb.mxu2 %v1168_v12 }
  0x4c   : > { %607 = vmatpush.msrb.mxu3 %v1241_v23  ;;  %484 = vmatpush.msrb.mxu0 %v1254_v25 }
  0x4d   : > { %533 = vmatpush.msrb.mxu1 %v1439_v48  ;;  %582 = vmatpush.msrb.mxu2 %v1181_v14 }
  0x4e   : > { %608 = vmatpush.msrb.mxu3 %v1254_v25  ;;  %485 = vmatpush.msrb.mxu0 %v1267_v27 }
  0x4f   : > { %534 = vmatpush.msrb.mxu1 %v1447_v49  ;;  %583 = vmatpush.msrb.mxu2 %v1194_v16 }
  0x50   : > { %609 = vmatpush.msrb.mxu3 %v1267_v27  ;;  %486 = vmatpush.msrb.mxu0 %v1281_v31 }
  0x51   : > { %535 = vmatpush.msrb.mxu1 %v1455_v52  ;;  %584 = vmatpush.msrb.mxu2 %v1207_v18 }
  0x52   : > { %610 = vmatpush.msrb.mxu3 %v1281_v31  ;;  %487 = vmatpush.msrb.mxu0 %v1294_v33 }
  0x53   : > { %536 = vmatpush.msrb.mxu1 %v1466_v55  ;;  %585 = vmatpush.msrb.mxu2 %v1220_v20 }
  0x54   : > { %611 = vmatpush.msrb.mxu3 %v1294_v33  ;;  %645 = vmatpush.msra.mxu0 %v1347_v36 }
  0x55   : > { %700 = vmatpush.msra.mxu1 %v1107_v2  ;;  %586 = vmatpush.msrb.mxu2 %v1233_v22 }
  0x56   : > { %646 = vmatpush.msra.mxu0 %v1354_v37 }
  0x57   : > { %701 = vmatpush.msra.mxu1 %v1119_v4  ;;  %587 = vmatpush.msrb.mxu2 %v1246_v24 }
  0x58   : > { %647 = vmatpush.msra.mxu0 %v1362_v38 }
  0x59   : > { %702 = vmatpush.msra.mxu1 %v1129_v6  ;;  %588 = vmatpush.msrb.mxu2 %v1259_v26 }
  0x5a   : > { %648 = vmatpush.msra.mxu0 %v1370_v39 }
  0x5b   : > { %703 = vmatpush.msra.mxu1 %v1142_v8  ;;  %589 = vmatpush.msrb.mxu2 %v1272_v28 }
  0x5c   : > { %649 = vmatpush.msra.mxu0 %v1378_v40 }
  0x5d   : > { %704 = vmatpush.msra.mxu1 %v1155_v10  ;;  %590 = vmatpush.msrb.mxu2 %v1286_v32 }
  0x5e   : > { %650 = vmatpush.msra.mxu0 %v1386_v41 }
  0x5f   : > { %705 = vmatpush.msra.mxu1 %v1168_v12  ;;  %591 = vmatpush.msrb.mxu2 %v1301_v35 }
  0x60   : > { %651 = vmatpush.msra.mxu0 %v1394_v42 }
  0x61   : > { %706 = vmatpush.msra.mxu1 %v1181_v14 }
  0x62   : > { %652 = vmatpush.msra.mxu0 %v1402_v43 }
  0x63   : > { %707 = vmatpush.msra.mxu1 %v1194_v16 }
  0x64   : > { %653 = vmatpush.msra.mxu0 %v1410_v44 }
  0x65   : > { %708 = vmatpush.msra.mxu1 %v1207_v18 }
  0x66   : > { %654 = vmatpush.msra.mxu0 %v1418_v45 }
  0x67   : > { %709 = vmatpush.msra.mxu1 %v1220_v20 }
  0x68   : > { %655 = vmatpush.msra.mxu0 %v1423_v46 }
  0x69   : > { %710 = vmatpush.msra.mxu1 %v1233_v22 }
  0x6a   : > { %656 = vmatpush.msra.mxu0 %v1431_v47 }
  0x6b   : > { %711 = vmatpush.msra.mxu1 %v1246_v24 }
  0x6c   : > { %657 = vmatpush.msra.mxu0 %v1439_v48 }
  0x6d   : > { %712 = vmatpush.msra.mxu1 %v1259_v26 }
  0x6e   : > { %658 = vmatpush.msra.mxu0 %v1447_v49 }
  0x6f   : > { %713 = vmatpush.msra.mxu1 %v1272_v28 }
  0x70   : > { %659 = vmatpush.msra.mxu0 %v1455_v52 }
  0x71   : > { %714 = vmatpush.msra.mxu1 %v1286_v32 }
  0x72   : > { %660 = vmatpush.msra.mxu0 %v1466_v55 }
  0x73   : > { %715 = vmatpush.msra.mxu1 %v1301_v35 }
  0xb0   : > { %v365_v50 = vpop.f32.mrf.mxu1  ;;  %v345_v51 = vpop.f32.mrf.mxu0 }
  0xb1   : > { %v370_v53 = vrot.slane %v365_v50, 6 }
  0xb3   : > { %v372_v56 = vsel %vm371_vm0, %v345_v51, %v370_v53 }
  0xb4   : > { %v1473_v57 = vadd.f32 %v372_v56, %v1459_v54 }
  0xb6   : > { %v376_v58 = vrot.slane %v1473_v57, 2 }
  0xb8   : > { %v931_v59 = vmul.f32 -1.442695, %v376_v58 }
  0xba   : > { %976 = vpow2.f32 %v931_v59 }
  0xc0   : > { %v977_v60 = vpop.eup %976 }
  0xc1   : > { %v381_v61 = vadd.f32 1.0, %v977_v60 }
  0xc3   : > { %978 = vrcp.f32 %v381_v61  ;;  %v393_v2 = vand.u32 2147483648, %v381_v61  ;;  %v391_v6 = vand.u32 2147483647, %v381_v61  ;;  %vm387_vm2 = vweird.f32 %v381_v61 }
  0xc5   : > { %v394_v10 = vor.u32 1.1754944e-38, %v393_v2  ;;  %vm392_vm4 = vcmp.eq.f32.partialorder %v391_v6, 8.507059e+37 }
  0xc9   : > { %v979_v62 = vpop.eup %978 }
  0xca   : > { %v383_v63 = vmul.f32 %v979_v62, %v381_v61  ;;  %vm388_vm1 = vweird.f32 %v979_v62 }
  0xcb   : > { %vm389_vm3 = vmor %vm387_vm2, %vm388_vm1 }
  0xcc   : > { %v384_v0 = vsub.f32 1.0, %v383_v63 }
  0xce   : > { %v385_v4 = vmul.f32 %v979_v62, %v384_v0 }
  0xd0   : > { %v386_v8 = vadd.f32 %v979_v62, %v385_v4 }
  0xd2   : > { %v390_v12 = vsel %vm389_vm3, %v979_v62, %v386_v8 }
  0xd3   : > { %v395_v14 = vsel %vm392_vm4, %v394_v10, %v390_v12 }
  0xd4   : > { %v397_v16 = vmul.f32 %v395_v14, %v1296_v34 }
  0xd6   : > { %414 = vmatmul.f32.vlgmr.msra.gmra.mxu2 %v397_v16 }
  0xd7   : > { %720 = vmatpush.msra.mxu2 %v1102_v1  ;;  %v932_v1 = vmul.f32 -1.442695, %v1473_v57 }
  0xd9   : > { %721 = vmatpush.msra.mxu2 %v1112_v3  ;;  %980 = vpow2.f32 %v932_v1  ;;  %v939_v1 = vld [vmem:[%s1087_s24 + $0x4] sm:$0x3] }
  0xdb   : > { %722 = vmatpush.msra.mxu2 %v1124_v5 }
  0xdd   : > { %723 = vmatpush.msra.mxu2 %v1137_v7 }
  0xdf   : > { %724 = vmatpush.msra.mxu2 %v1150_v9  ;;  %v981_v3 = vpop.eup %980 }
  0xe0   : > { %v426_v5 = vadd.f32 1.0, %v981_v3 }
  0xe1   : > { %725 = vmatpush.msra.mxu2 %v1163_v11 }
  0xe2   : > { %982 = vrcp.f32 %v426_v5  ;;  %v438_v18 = vand.u32 2147483648, %v426_v5  ;;  %vm432_vm6 = vweird.f32 %v426_v5 }
  0xe3   : > { %726 = vmatpush.msra.mxu2 %v1176_v13 }
  0xe5   : > { %727 = vmatpush.msra.mxu2 %v1189_v15 }
  0xe7   : > { %728 = vmatpush.msra.mxu2 %v1202_v17  ;;  %v419_v17 = vrot.slane %v1459_v54, 4 }
  0xe8   : > { %v983_v7 = vpop.eup %982 }
  0xe9   : > { %729 = vmatpush.msra.mxu2 %v1215_v19  ;;  %v428_v9 = vmul.f32 %v983_v7, %v426_v5  ;;  %vm433_vm5 = vweird.f32 %v983_v7  ;;  %v436_v19 = vand.u32 2147483647, %v426_v5 }
  0xea   : > { %vm434_vm7 = vmor %vm432_vm6, %vm433_vm5 }
  0xeb   : > { %730 = vmatpush.msra.mxu2 %v1228_v21  ;;  %v429_v11 = vsub.f32 1.0, %v428_v9  ;;  %vm437_vm8 = vcmp.eq.f32.partialorder %v436_v19, 8.507059e+37  ;;  %v938_v9 = vld [vmem:[%s1097_s30 + $0xc] sm:$0x3f] }
  0xed   : > { %731 = vmatpush.msra.mxu2 %v1241_v23  ;;  %v430_v13 = vmul.f32 %v983_v7, %v429_v11  ;;  %v439_v23 = vor.u32 1.1754944e-38, %v438_v18 }
  0xef   : > { %732 = vmatpush.msra.mxu2 %v1254_v25  ;;  %v431_v15 = vadd.f32 %v983_v7, %v430_v13 }
  0xf1   : > { %733 = vmatpush.msra.mxu2 %v1267_v27  ;;  %v435_v21 = vsel %vm434_vm7, %v983_v7, %v431_v15 }
  0xf2   : > { %v440_v24 = vsel %vm437_vm8, %v439_v23, %v435_v21 }
  0xf3   : > { %734 = vmatpush.msra.mxu2 %v1281_v31  ;;  %v442_v25 = vsub.f32 1.0, %v440_v24 }
  0xf5   : > { %735 = vmatpush.msra.mxu2 %v1294_v33  ;;  %v443_v28 = vmul.f32 %v442_v25, %v1296_v34  ;;  %v933_v34 = vld [vmem:[%s1097_s30 + $0x6] sm:$0x3f] }
  0xf6   : > { %v542_v61 = vrot.slane %v933_v34, 4 }
 0x159   : > { %v415_v20 = vpop.f32.mrf.mxu2 }
 0x15a   : > { %v421_v22 = vadd.f32 %v419_v17, %v415_v20 }
 0x15c   : > { %984 = vtanh.f32 %v421_v22 }
 0x162   : > { %v985_v26 = vpop.eup %984 }
 0x163   : > { %v444_v27 = vmul.f32 %v985_v26, %v440_v24 }
 0x165   : > { %v445_v30 = vadd.f32 %v444_v27, %v443_v28 }
 0x167   : > { %446 = vst [vmem:[%s1092_s27] sm:$0x3] %v445_v30  ;;  %v1534_v31 = vmul.f32 %v934_v29, %v445_v30 }
 0x169   : > { %468 = vmatmul.f32.vlgmr.msra.gmra.mxu3 %v1534_v31  ;;  %488 = vmatmul.f32.vlgmr.msrb.gmra.mxu0 %v1534_v31 }
 0x16a   : > { %769 = vmatpush.msra.mxu3 %v1347_v36 }
 0x16c   : > { %770 = vmatpush.msra.mxu3 %v1354_v37 }
 0x16e   : > { %771 = vmatpush.msra.mxu3 %v1362_v38 }
 0x170   : > { %772 = vmatpush.msra.mxu3 %v1370_v39 }
 0x172   : > { %773 = vmatpush.msra.mxu3 %v1378_v40 }
 0x174   : > { %774 = vmatpush.msra.mxu3 %v1386_v41 }
 0x176   : > { %775 = vmatpush.msra.mxu3 %v1394_v42 }
 0x178   : > { %776 = vmatpush.msra.mxu3 %v1402_v43 }
 0x17a   : > { %777 = vmatpush.msra.mxu3 %v1410_v44 }
 0x17c   : > { %778 = vmatpush.msra.mxu3 %v1418_v45 }
 0x17e   : > { %779 = vmatpush.msra.mxu3 %v1423_v46 }
 0x180   : > { %780 = vmatpush.msra.mxu3 %v1431_v47 }
 0x182   : > { %781 = vmatpush.msra.mxu3 %v1439_v48 }
 0x184   : > { %782 = vmatpush.msra.mxu3 %v1447_v49 }
 0x186   : > { %783 = vmatpush.msra.mxu3 %v1455_v52 }
 0x188   : > { %784 = vmatpush.msra.mxu3 %v1466_v55 }
 0x1e6   : > { %v489_v32 = vpop.f32.mrf.mxu0 }
 0x1e7   : > { %v494_v33 = vrot.slane %v489_v32, 6 }
 0x1ec   : > { %v469_v35 = vpop.f32.mrf.mxu3 }
 0x1ed   : > { %v495_v36 = vsel %vm371_vm0, %v469_v35, %v494_v33 }
 0x1ee   : > { %v497_v37 = vadd.f32 %v933_v34, %v495_v36 }
 0x1f0   : > { %v499_v38 = vrot.slane %v497_v37, 2  ;;  %v936_v53 = vmul.f32 -1.442695, %v497_v37 }
 0x1f2   : > { %v935_v39 = vmul.f32 -1.442695, %v499_v38 }
 0x1f4   : > { %986 = vpow2.f32 %v935_v39 }
 0x1fa   : > { %v987_v40 = vpop.eup %986 }
 0x1fb   : > { %v504_v41 = vadd.f32 1.0, %v987_v40 }
 0x1fd   : > { %988 = vrcp.f32 %v504_v41  ;;  %v516_v45 = vand.u32 2147483648, %v504_v41  ;;  %v514_v47 = vand.u32 2147483647, %v504_v41  ;;  %vm510_vm10 = vweird.f32 %v504_v41 }
 0x1fe   : > { %990 = vpow2.f32 %v936_v53  ;;  %v944_v53 = vld [vmem:[%s1087_s24 + $0x6] sm:$0x3] }
 0x1ff   : > { %v517_v49 = vor.u32 1.1754944e-38, %v516_v45  ;;  %vm515_vm12 = vcmp.eq.f32.partialorder %v514_v47, 8.507059e+37 }
 0x203   : > { %v989_v42 = vpop.eup %988 }
 0x204   : > { %v506_v43 = vmul.f32 %v989_v42, %v504_v41  ;;  %vm511_vm9 = vweird.f32 %v989_v42  ;;  %v991_v54 = vpop.eup %990  ;;  %v666_v41 = vrot.slane %v938_v9, 4 }
 0x205   : > { %vm512_vm11 = vmor %vm510_vm10, %vm511_vm9  ;;  %v549_v55 = vadd.f32 1.0, %v991_v54 }
 0x206   : > { %v507_v44 = vsub.f32 1.0, %v506_v43 }
 0x207   : > { %992 = vrcp.f32 %v549_v55  ;;  %v561_v62 = vand.u32 2147483648, %v549_v55  ;;  %vm555_vm14 = vweird.f32 %v549_v55  ;;  %v559_v63 = vand.u32 2147483647, %v549_v55 }
 0x208   : > { %v508_v46 = vmul.f32 %v989_v42, %v507_v44 }
 0x209   : > { %v562_v6 = vor.u32 1.1754944e-38, %v561_v62  ;;  %vm560_vm1 = vcmp.eq.f32.partialorder %v559_v63, 8.507059e+37 }
 0x20a   : > { %v509_v48 = vadd.f32 %v989_v42, %v508_v46 }
 0x20c   : > { %v513_v50 = vsel %vm512_vm11, %v989_v42, %v509_v48 }
 0x20d   : > { %v518_v51 = vsel %vm515_vm12, %v517_v49, %v513_v50  ;;  %v993_v56 = vpop.eup %992 }
 0x20e   : > { %v520_v52 = vmul.f32 %v518_v51, %v1534_v31  ;;  %v551_v57 = vmul.f32 %v993_v56, %v549_v55  ;;  %vm556_vm13 = vweird.f32 %v993_v56 }
 0x20f   : > { %vm557_vm15 = vmor %vm555_vm14, %vm556_vm13 }
 0x210   : > { %537 = vmatmul.f32.vlgmr.msrb.gmra.mxu1 %v520_v52  ;;  %v552_v58 = vsub.f32 1.0, %v551_v57  ;;  %v943_v57 = vld [vmem:[%s1097_s30 + $0x12] sm:$0x3f] }
 0x212   : > { %v553_v59 = vmul.f32 %v993_v56, %v552_v58 }
 0x214   : > { %v554_v60 = vadd.f32 %v993_v56, %v553_v59 }
 0x216   : > { %v558_v2 = vsel %vm557_vm15, %v993_v56, %v554_v60 }
 0x217   : > { %v563_v8 = vsel %vm560_vm1, %v562_v6, %v558_v2 }
 0x218   : > { %v565_v10 = vsub.f32 1.0, %v563_v8 }
 0x21a   : > { %v566_v16 = vmul.f32 %v565_v10, %v1534_v31 }
 0x28d   : > { %v538_v0 = vpop.f32.mrf.mxu1 }
 0x28e   : > { %v544_v4 = vadd.f32 %v542_v61, %v538_v0 }
 0x290   : > { %994 = vtanh.f32 %v544_v4 }
 0x296   : > { %v995_v12 = vpop.eup %994 }
 0x297   : > { %v567_v14 = vmul.f32 %v995_v12, %v563_v8 }
 0x299   : > { %v568_v3 = vadd.f32 %v567_v14, %v566_v16 }
 0x29b   : > { %937 = vst [vmem:[%s1092_s27 + $0x2] sm:$0x3] %v568_v3  ;;  %v575_v5 = vmul.f32 %v939_v1, %v568_v3 }
 0x29d   : > { %592 = vmatmul.f32.vlgmr.msrb.gmra.mxu2 %v575_v5  ;;  %612 = vmatmul.f32.vlgmr.msrb.gmra.mxu3 %v575_v5 }
 0x320   : > { %v613_v7 = vpop.f32.mrf.mxu3  ;;  %v593_v13 = vpop.f32.mrf.mxu2 }
 0x321   : > { %v618_v11 = vrot.slane %v613_v7, 6 }
 0x323   : > { %v619_v15 = vsel %vm371_vm0, %v593_v13, %v618_v11 }
 0x324   : > { %v621_v17 = vadd.f32 %v938_v9, %v619_v15 }
 0x326   : > { %v623_v18 = vrot.slane %v621_v17, 2  ;;  %v941_v33 = vmul.f32 -1.442695, %v621_v17 }
 0x328   : > { %v940_v19 = vmul.f32 -1.442695, %v623_v18 }
 0x32a   : > { %996 = vpow2.f32 %v940_v19 }
 0x330   : > { %v997_v20 = vpop.eup %996 }
 0x331   : > { %v628_v21 = vadd.f32 1.0, %v997_v20 }
 0x333   : > { %998 = vrcp.f32 %v628_v21  ;;  %v640_v25 = vand.u32 2147483648, %v628_v21  ;;  %v638_v27 = vand.u32 2147483647, %v628_v21  ;;  %vm634_vm3 = vweird.f32 %v628_v21 }
 0x334   : > { %1000 = vpow2.f32 %v941_v33 }
 0x335   : > { %v641_v29 = vor.u32 1.1754944e-38, %v640_v25  ;;  %vm639_vm5 = vcmp.eq.f32.partialorder %v638_v27, 8.507059e+37 }
 0x339   : > { %v999_v22 = vpop.eup %998 }
 0x33a   : > { %v630_v23 = vmul.f32 %v999_v22, %v628_v21  ;;  %vm635_vm2 = vweird.f32 %v999_v22  ;;  %v1001_v34 = vpop.eup %1000  ;;  %v790_v21 = vrot.slane %v943_v57, 4 }
 0x33b   : > { %vm636_vm4 = vmor %vm634_vm3, %vm635_vm2  ;;  %v673_v35 = vadd.f32 1.0, %v1001_v34 }
 0x33c   : > { %v631_v24 = vsub.f32 1.0, %v630_v23 }
 0x33d   : > { %1002 = vrcp.f32 %v673_v35  ;;  %v685_v42 = vand.u32 2147483648, %v673_v35  ;;  %vm679_vm7 = vweird.f32 %v673_v35  ;;  %v683_v43 = vand.u32 2147483647, %v673_v35 }
 0x33e   : > { %v632_v26 = vmul.f32 %v999_v22, %v631_v24 }
 0x33f   : > { %v686_v47 = vor.u32 1.1754944e-38, %v685_v42  ;;  %vm684_vm9 = vcmp.eq.f32.partialorder %v683_v43, 8.507059e+37 }
 0x340   : > { %v633_v28 = vadd.f32 %v999_v22, %v632_v26 }
 0x342   : > { %v637_v30 = vsel %vm636_vm4, %v999_v22, %v633_v28 }
 0x343   : > { %v642_v31 = vsel %vm639_vm5, %v641_v29, %v637_v30  ;;  %v1003_v36 = vpop.eup %1002 }
 0x344   : > { %v644_v32 = vmul.f32 %v642_v31, %v575_v5  ;;  %v675_v37 = vmul.f32 %v1003_v36, %v673_v35  ;;  %vm680_vm6 = vweird.f32 %v1003_v36 }
 0x345   : > { %vm681_vm8 = vmor %vm679_vm7, %vm680_vm6 }
 0x346   : > { %661 = vmatmul.f32.vlgmr.msra.gmra.mxu0 %v644_v32  ;;  %v676_v38 = vsub.f32 1.0, %v675_v37 }
 0x348   : > { %v677_v39 = vmul.f32 %v1003_v36, %v676_v38 }
 0x34a   : > { %v678_v40 = vadd.f32 %v1003_v36, %v677_v39 }
 0x34c   : > { %v682_v45 = vsel %vm681_vm8, %v1003_v36, %v678_v40 }
 0x34d   : > { %v687_v48 = vsel %vm684_vm9, %v686_v47, %v682_v45 }
 0x34e   : > { %v689_v49 = vsub.f32 1.0, %v687_v48 }
 0x350   : > { %v690_v52 = vmul.f32 %v689_v49, %v575_v5 }
 0x3c3   : > { %v662_v44 = vpop.f32.mrf.mxu0 }
 0x3c4   : > { %v668_v46 = vadd.f32 %v666_v41, %v662_v44 }
 0x3c6   : > { %1004 = vtanh.f32 %v668_v46 }
 0x3cc   : > { %v1005_v50 = vpop.eup %1004 }
 0x3cd   : > { %v691_v51 = vmul.f32 %v1005_v50, %v687_v48 }
 0x3cf   : > { %v692_v54 = vadd.f32 %v691_v51, %v690_v52 }
 0x3d1   : > { %942 = vst [vmem:[%s1092_s27 + $0x4] sm:$0x3] %v692_v54  ;;  %v699_v55 = vmul.f32 %v944_v53, %v692_v54 }
 0x3d3   : > { %716 = vmatmul.f32.vlgmr.msra.gmra.mxu1 %v699_v55  ;;  %736 = vmatmul.f32.vlgmr.msra.gmra.mxu2 %v699_v55 }
 0x450   : > { %v717_v59 = vpop.f32.mrf.mxu1 }
 0x456   : > { %v737_v56 = vpop.f32.mrf.mxu2 }
 0x457   : > { %v742_v58 = vrot.slane %v737_v56, 6 }
 0x459   : > { %v743_v60 = vsel %vm371_vm0, %v717_v59, %v742_v58 }
 0x45a   : > { %v745_v61 = vadd.f32 %v943_v57, %v743_v60 }
 0x45c   : > { %v747_v62 = vrot.slane %v745_v61, 2  ;;  %v946_v9 = vmul.f32 -1.442695, %v745_v61 }
 0x45e   : > { %v945_v63 = vmul.f32 -1.442695, %v747_v62 }
 0x460   : > { %1006 = vpow2.f32 %v945_v63 }
 0x466   : > { %v1007_v0 = vpop.eup %1006 }
 0x467   : > { %v752_v2 = vadd.f32 1.0, %v1007_v0 }
 0x469   : > { %1008 = vrcp.f32 %v752_v2  ;;  %v764_v10 = vand.u32 2147483648, %v752_v2  ;;  %v762_v14 = vand.u32 2147483647, %v752_v2  ;;  %vm758_vm11 = vweird.f32 %v752_v2 }
 0x46a   : > { %1010 = vpow2.f32 %v946_v9 }
 0x46b   : > { %v765_v1 = vor.u32 1.1754944e-38, %v764_v10  ;;  %vm763_vm0 = vcmp.eq.f32.partialorder %v762_v14, 8.507059e+37 }
 0x46f   : > { %v1009_v4 = vpop.eup %1008 }
 0x470   : > { %v754_v6 = vmul.f32 %v1009_v4, %v752_v2  ;;  %vm759_vm10 = vweird.f32 %v1009_v4  ;;  %v1011_v11 = vpop.eup %1010 }
 0x471   : > { %vm760_vm12 = vmor %vm758_vm11, %vm759_vm10  ;;  %v797_v13 = vadd.f32 1.0, %v1011_v11 }
 0x472   : > { %v755_v8 = vsub.f32 1.0, %v754_v6 }
 0x473   : > { %1012 = vrcp.f32 %v797_v13  ;;  %v809_v22 = vand.u32 2147483648, %v797_v13  ;;  %vm803_vm14 = vweird.f32 %v797_v13  ;;  %v807_v23 = vand.u32 2147483647, %v797_v13 }
 0x474   : > { %v756_v12 = vmul.f32 %v1009_v4, %v755_v8 }
 0x475   : > { %v810_v27 = vor.u32 1.1754944e-38, %v809_v22  ;;  %vm808_vm1 = vcmp.eq.f32.partialorder %v807_v23, 8.507059e+37 }
 0x476   : > { %v757_v16 = vadd.f32 %v1009_v4, %v756_v12 }
 0x478   : > { %v761_v3 = vsel %vm760_vm12, %v1009_v4, %v757_v16 }
 0x479   : > { %v766_v5 = vsel %vm763_vm0, %v765_v1, %v761_v3  ;;  %v1013_v15 = vpop.eup %1012 }
 0x47a   : > { %v768_v7 = vmul.f32 %v766_v5, %v699_v55  ;;  %v799_v17 = vmul.f32 %v1013_v15, %v797_v13  ;;  %vm804_vm13 = vweird.f32 %v1013_v15 }
 0x47b   : > { %vm805_vm15 = vmor %vm803_vm14, %vm804_vm13 }
 0x47c   : > { %785 = vmatmul.f32.vlgmr.msra.gmra.mxu3 %v768_v7  ;;  %v800_v18 = vsub.f32 1.0, %v799_v17 }
 0x47e   : > { %v801_v19 = vmul.f32 %v1013_v15, %v800_v18 }
 0x480   : > { %v802_v20 = vadd.f32 %v1013_v15, %v801_v19 }
 0x482   : > { %v806_v25 = vsel %vm805_vm15, %v1013_v15, %v802_v20 }
 0x483   : > { %v811_v28 = vsel %vm808_vm1, %v810_v27, %v806_v25 }
 0x484   : > { %v813_v29 = vsub.f32 1.0, %v811_v28 }
 0x486   : > { %v814_v31 = vmul.f32 %v813_v29, %v699_v55 }
 0x4ff   : > { %v786_v24 = vpop.f32.mrf.mxu3 }
 0x500   : > { %v792_v26 = vadd.f32 %v790_v21, %v786_v24 }
 0x502   : > { %1014 = vtanh.f32 %v792_v26 }
 0x508   : > { %v1015_v30 = vpop.eup %1014 }
 0x509   : > { %v815_v32 = vmul.f32 %v1015_v30, %v811_v28 }
 0x50b   : > { %v816_v33 = vadd.f32 %v815_v32, %v814_v31 }
 0x50d   : > { %947 = vst [vmem:[%s1092_s27 + $0x6] sm:$0x3] %v816_v33 }
 0x50e   : > { %819 = vst [vmem:[#allocation2] sm:$0x3] %v816_v33 }
 0x50f PF: > { %s14_s17 = sadd.s32 1, %s1038_s17   ;;  %s1581_s15 = smov %s1034_s16 }
 0x510   : > { %p11_p6 = scmp.ge.s32.totalorder %s14_s17, 5   ;;  %s1582_s16 = smov %s1584_s18 }
 0x512   :  { %13 = sbr.rel (!%p11_p6) target bundleno = 2 (0x2), region = 82 }

</bundles_post_ra>
